<compile_context>
chip_gen: v6e
topology: v6e:2x2x1
jax: 0.10.0
libtpu: 0.0.40
codegen_flags: <defaults>
</compile_context>

<pallas_src>
import functools

import jax
import jax.numpy as jnp
from jax.experimental import pallas as pl
from jax.experimental.pallas import tpu as pltpu


# --------------------------------------------------------------------------------------
# Exact mirror of the PyTorch get_time_context (used only by the pure-JAX reference).
# --------------------------------------------------------------------------------------
def get_time_context(x, c=(0,)):
    c = list(c)
    l = len(c) - 1
    return [x[:, c[l] + cc:c[0] + cc, :] if cc != c[l] else x[:, c[l] + cc:, :] for cc in c]


def _round_up(v, m):
    return ((v + m - 1) // m) * m


# --------------------------------------------------------------------------------------
# Kernel A: fused splice + Linear + ReLU + masked per-tile BatchNorm partial statistics.
# --------------------------------------------------------------------------------------
def _tdnn_linear_relu_stats_kernel(x_ref, w_ref, b_ref, y_ref, ssum_ref, ssq_ref,
                                   *, offsets, time_tile, t_out):
    """One (batch, time-tile) grid point.

    x_ref   : (1, T_in_pad, F)       f32  whole padded time axis of this batch element
    w_ref   : (nc, F, O_pad)         bf16 per-context-slot weight blocks (grid-invariant)
    b_ref   : (1, O_pad)             f32
    y_ref   : (1, time_tile, O_pad)  bf16 Linear+ReLU activations for this tile
    ssum_ref: (1, 1, 1, O_pad)       f32  masked per-tile sum   (BN partial stats)
    ssq_ref : (1, 1, 1, O_pad)       f32  masked per-tile sum^2 (BN partial stats)
    """
    nc, _, o_pad = w_ref.shape
    ti = pl.program_id(1)
    t0 = ti * time_tile

    # Spliced Linear as nc small MXU dots (bf16 inputs, f32 accumulation).
    acc = jnp.zeros((time_tile, o_pad), jnp.float32)
    for j in range(nc):                                   # static unroll over context slots
        xj = x_ref[0, pl.ds(t0 + offsets[j], time_tile), :].astype(jnp.bfloat16)
        acc = acc + jnp.dot(xj, w_ref[j], preferred_element_type=jnp.float32)

    y = jnp.maximum(acc + b_ref[...], 0.0)                # (time_tile, O_pad) f32
    y_ref[0] = y.astype(y_ref.dtype)

    # BatchNorm partial statistics; rows that are pure time-padding are masked out.
    t_idx = t0 + jax.lax.broadcasted_iota(jnp.int32, (time_tile, 1), 0)
    ym = jnp.where(t_idx < t_out, y, 0.0)
    ssum_ref[0, 0] = jnp.sum(ym, axis=0, keepdims=True)
    ssq_ref[0, 0] = jnp.sum(ym * ym, axis=0, keepdims=True)


def tdnn_fused_linear_relu_stats(x_pad, w_blocks, bias, *, offsets, time_tile, t_out, n_tb):
    B, T_in_pad, F = x_pad.shape
    nc, _, O_pad = w_blocks.shape
    T_out_pad = n_tb * time_tile
    kernel = functools.partial(_tdnn_linear_relu_stats_kernel,
                               offsets=tuple(int(o) for o in offsets),
                               time_tile=time_tile, t_out=t_out)
    return pl.pallas_call(
        kernel,
        out_shape=(
            jax.ShapeDtypeStruct((B, T_out_pad, O_pad), jnp.bfloat16),
            jax.ShapeDtypeStruct((B, n_tb, 1, O_pad), jnp.float32),
            jax.ShapeDtypeStruct((B, n_tb, 1, O_pad), jnp.float32),
        ),
        grid_spec=pltpu.PrefetchScalarGridSpec(
            num_scalar_prefetch=0,
            grid=(B, n_tb),
            in_specs=[
                # Whole padded time axis of one batch element: block index depends only on
                # the batch grid index -> DMA'd once per batch element, reused for all time
                # tiles (no spliced (B, T_out, K) concat written to / read from HBM).
                # NOTE: for extremely long sequences (> ~100k frames at F=24) this per-batch
                # window should be chunked; fine for TDNN-scale utterances.
                pl.BlockSpec((1, T_in_pad, F), lambda b, ti: (b, 0, 0)),
                # Weights / bias are grid-invariant -> fetched once, resident in VMEM.
                pl.BlockSpec((nc, F, O_pad), lambda b, ti: (0, 0, 0)),
                pl.BlockSpec((1, O_pad), lambda b, ti: (0, 0)),
            ],
            out_specs=[
                pl.BlockSpec((1, time_tile, O_pad), lambda b, ti: (b, ti, 0)),
                pl.BlockSpec((1, 1, 1, O_pad), lambda b, ti: (b, ti, 0, 0)),
                pl.BlockSpec((1, 1, 1, O_pad), lambda b, ti: (b, ti, 0, 0)),
            ],
        ),
        compiler_params=pltpu.CompilerParams(
            dimension_semantics=("parallel", "parallel"),
            vmem_limit_bytes=32 * 1024 * 1024,   # safe on v5e/v6e/v7x; well above budget
        ),
    )(x_pad, w_blocks, bias)


# --------------------------------------------------------------------------------------
# Kernel B: row-tiled BatchNorm apply (y * scale + shift), lane-dense over channels.
# --------------------------------------------------------------------------------------
def _bn_scale_shift_kernel(y_ref, a_ref, c_ref, o_ref):
    o_ref[...] = y_ref[...].astype(jnp.float32) * a_ref[...] + c_ref[...]


def bn_scale_shift(y_pad, scale, shift, *, time_tile):
    B, T_out_pad, O_pad = y_pad.shape
    n_tb = T_out_pad // time_tile
    return pl.pallas_call(
        _bn_scale_shift_kernel,
        out_shape=jax.ShapeDtypeStruct((B, T_out_pad, O_pad), jnp.float32),
        grid_spec=pltpu.PrefetchScalarGridSpec(
            num_scalar_prefetch=0,
            grid=(B, n_tb),
            in_specs=[
                pl.BlockSpec((1, time_tile, O_pad), lambda b, ti: (b, ti, 0)),
                pl.BlockSpec((1, 1, O_pad), lambda b, ti: (0, 0, 0)),
                pl.BlockSpec((1, 1, O_pad), lambda b, ti: (0, 0, 0)),
            ],
            out_specs=pl.BlockSpec((1, time_tile, O_pad), lambda b, ti: (b, ti, 0)),
        ),
        compiler_params=pltpu.CompilerParams(
            dimension_semantics=("parallel", "parallel"),
            vmem_limit_bytes=32 * 1024 * 1024,
        ),
    )(y_pad, scale, shift)


# --------------------------------------------------------------------------------------
# Full TdnnLayer forward.
# --------------------------------------------------------------------------------------
def tdnn_layer_forward(x, params, context, *, eps=1e-5, time_tile=256):
    """x: (B, T, input_size) f32 -> (B, T - (context[-1]-context[0]), output_size) f32."""
    w_t, bias, gamma, beta = params              # w_t: (K, O) = transposed torch weight
    B, T, F = x.shape
    nc = len(context)
    span = context[-1] - context[0]
    t_out = T - span
    K, O = w_t.shape
    assert K == nc * F

    # Per-slot time offsets exactly as the PyTorch get_time_context slicing (start = c[-1]+cc).
    offsets = [context[-1] + cc for cc in context]

    O_pad = _round_up(O, 128)                    # lane-dense output channels
    # Row (time) tile: target 256 rows (sweep 256/512) for MXU / per-step-overhead efficiency,
    # clamped to the 8-aligned actual row count so small inputs don't over-pad.
    tt = max(8, min(time_tile, _round_up(t_out, 8)))
    n_tb = pl.cdiv(t_out, tt)
    T_out_pad = n_tb * tt
    T_in_pad = max(T, T_out_pad + max(offsets))

    # Host-side prep: zero-pad x in time, reshape/pad weights per context slot (bf16 for MXU).
    x_pad = jnp.pad(x.astype(jnp.float32), ((0, 0), (0, T_in_pad - T), (0, 0)))
    w_blocks = jnp.pad(w_t.reshape(nc, F, O).astype(jnp.float32),
                       ((0, 0), (0, 0), (0, O_pad - O))).astype(jnp.bfloat16)
    b_pad = jnp.pad(bias.reshape(1, O).astype(jnp.float32), ((0, 0), (0, O_pad - O)))
    gamma_pad = jnp.pad(gamma.reshape(O).astype(jnp.float32), (0, O_pad - O),
                        constant_values=1.0)
    beta_pad = jnp.pad(beta.reshape(O).astype(jnp.float32), (0, O_pad - O))

    # Kernel A: fused splice + Linear + ReLU + masked BN partial statistics.
    y_pad, ssum, ssq = tdnn_fused_linear_relu_stats(
        x_pad, w_blocks, b_pad, offsets=offsets, time_tile=tt, t_out=t_out, n_tb=n_tb)

    # Tiny O-length reduction: train-mode BatchNorm1d stats (biased variance over all
    # B*t_out rows), folded into a per-channel scale/shift.
    cnt = jnp.float32(B * t_out)
    mean = jnp.sum(ssum, axis=(0, 1, 2)) / cnt
    var = jnp.maximum(jnp.sum(ssq, axis=(0, 1, 2)) / cnt - mean * mean, 0.0)
    rstd = jax.lax.rsqrt(var + eps)
    scale = (gamma_pad * rstd).reshape(1, 1, O_pad)
    shift = (beta_pad - mean * gamma_pad * rstd).reshape(1, 1, O_pad)

    # Kernel B: normalize + affine.
    out_pad = bn_scale_shift(y_pad, scale, shift, time_tile=tt)

    # TODO(synk): BatchNorm running_mean/running_var buffer updates (training bookkeeping)
    # are not emitted; only the train-mode forward normalization is implemented.
    return out_pad[:, :t_out, :O]


# --------------------------------------------------------------------------------------
# Pure-JAX f32 reference (mirrors the PyTorch module exactly).
# --------------------------------------------------------------------------------------
def _reference_forward(x, params, context, eps=1e-5):
    w_t, bias, gamma, beta = params
    xc = jnp.concatenate(get_time_context(x, context), axis=2)
    y = jnp.maximum(xc @ w_t + bias, 0.0)
    B, T_out, O = y.shape
    y2 = y.reshape(B * T_out, O)
    mean = jnp.mean(y2, axis=0)
    var = jnp.mean((y2 - mean) ** 2, axis=0)     # biased var (PyTorch train-mode)
    out = (y2 - mean) * jax.lax.rsqrt(var + eps) * gamma + beta
    return out.reshape(B, T_out, O)


if __name__ == "__main__":
    # Small, module-consistent shapes (T chosen so the time-padding/masking path is exercised).
    B, T = 2, 21
    input_size = 24
    output_size = 128
    context = [-2, 0, 2]
    K = input_size * len(context)

    key = jax.random.PRNGKey(0)
    kx, kw, kb = jax.random.split(key, 3)
    x = jax.random.normal(kx, (B, T, input_size), dtype=jnp.float32)

    # Deterministic parameter init (PyTorch Linear default: U(-1/sqrt(K), 1/sqrt(K))).
    bound = 1.0 / (K ** 0.5)
    w = jax.random.uniform(kw, (output_size, K), jnp.float32, -bound, bound)  # torch (O, K)
    b = jax.random.uniform(kb, (output_size,), jnp.float32, -bound, bound)
    gamma = jnp.ones((output_size,), jnp.float32)    # BatchNorm1d affine init
    beta = jnp.zeros((output_size,), jnp.float32)

    params = (jnp.transpose(w), b, gamma, beta)      # (K, O), (O,), (O,), (O,)

    out = tdnn_layer_forward(x, params, context)
    out = jax.block_until_ready(out)

    ref = _reference_forward(x, params, context)
    t_out = T - (context[-1] - context[0])
    assert out.shape == (B, t_out, output_size), out.shape
    # bf16 MXU inputs / bf16 activation storage (f32 accumulation) -> relaxed tolerance.
    assert jnp.allclose(out, ref, atol=5e-2, rtol=5e-2), float(jnp.max(jnp.abs(out - ref)))

    print("KERNEL_OK")
</pallas_src>

<mosaic_0001>
module attributes {stable_mosaic.version = 11 : i64} {
  func.func @_tdnn_linear_relu_stats_kernel(%arg0: i32, %arg1: i32, %arg2: memref<1x28x24xf32, #tpu.memory_space<vmem>>, %arg3: memref<3x24x128xbf16, #tpu.memory_space<vmem>>, %arg4: memref<1x128xf32, #tpu.memory_space<vmem>>, %arg5: memref<1x24x128xbf16, #tpu.memory_space<vmem>>, %arg6: memref<1x1x1x128xf32, #tpu.memory_space<vmem>>, %arg7: memref<1x1x1x128xf32, #tpu.memory_space<vmem>>) attributes {dimension_semantics = [#tpu.dimension_semantics<parallel>, #tpu.dimension_semantics<parallel>], iteration_bounds = array<i64: 2, 1>, scalar_prefetch = 0 : i64, scratch_operands = 0 : i64, tpu.core_type = #tpu.core_type<tc>, window_params = [{transform_indices = @transform_0, window_bounds = array<i64: 1, 28, 24>}, {pipeline_mode = #tpu.pipeline_mode<synchronous>, transform_indices = @transform_1, window_bounds = array<i64: 3, 24, 128>}, {pipeline_mode = #tpu.pipeline_mode<synchronous>, transform_indices = @transform_2, window_bounds = array<i64: 1, 128>}, {transform_indices = @transform_3, window_bounds = array<i64: 1, 24, 128>}, {transform_indices = @transform_4, window_bounds = array<i64: 1, 1, 1, 128>}, {transform_indices = @transform_5, window_bounds = array<i64: 1, 1, 1, 128>}]} {
    %c24_i32 = arith.constant 24 : i32
    %0 = arith.muli %arg1, %c24_i32 : i32
    %cst = arith.constant 0.000000e+00 : f32
    %1 = vector.broadcast %cst : f32 to vector<24x128xf32>
    %c0_i32 = arith.constant 0 : i32
    %2 = arith.addi %0, %c0_i32 : i32
    %c0 = arith.constant 0 : index
    %3 = arith.index_cast %2 : i32 to index
    %c0_0 = arith.constant 0 : index
    %4 = vector.load %arg2[%c0, %3, %c0_0] : memref<1x28x24xf32, #tpu.memory_space<vmem>>, vector<1x24x24xf32>
    %5 = vector.shape_cast %4 : vector<1x24x24xf32> to vector<24x24xf32>
    %6 = arith.truncf %5 : vector<24x24xf32> to vector<24x24xbf16>
    %c0_1 = arith.constant 0 : index
    %c0_2 = arith.constant 0 : index
    %c0_3 = arith.constant 0 : index
    %7 = vector.load %arg3[%c0_1, %c0_2, %c0_3] : memref<3x24x128xbf16, #tpu.memory_space<vmem>>, vector<1x24x128xbf16>
    %8 = vector.shape_cast %7 : vector<1x24x128xbf16> to vector<24x128xbf16>
    %cst_4 = arith.constant dense<0.000000e+00> : vector<24x128xf32>
    %9 = tpu.matmul %6, %8, %cst_4 {dimension_numbers = #tpu.dot_dimension_numbers<[1], [0], [0], [1], [0, 0, 1, 1], [], []>} : vector<24x24xbf16>, vector<24x128xbf16>, vector<24x128xf32> -> vector<24x128xf32>
    %10 = arith.addf %1, %9 : vector<24x128xf32>
    %c2_i32 = arith.constant 2 : i32
    %11 = arith.addi %0, %c2_i32 : i32
    %c0_5 = arith.constant 0 : index
    %12 = arith.index_cast %11 : i32 to index
    %c0_6 = arith.constant 0 : index
    %13 = vector.load %arg2[%c0_5, %12, %c0_6] : memref<1x28x24xf32, #tpu.memory_space<vmem>>, vector<1x24x24xf32>
    %14 = vector.shape_cast %13 : vector<1x24x24xf32> to vector<24x24xf32>
    %15 = arith.truncf %14 : vector<24x24xf32> to vector<24x24xbf16>
    %c1 = arith.constant 1 : index
    %c0_7 = arith.constant 0 : index
    %c0_8 = arith.constant 0 : index
    %16 = vector.load %arg3[%c1, %c0_7, %c0_8] : memref<3x24x128xbf16, #tpu.memory_space<vmem>>, vector<1x24x128xbf16>
    %17 = vector.shape_cast %16 : vector<1x24x128xbf16> to vector<24x128xbf16>
    %cst_9 = arith.constant dense<0.000000e+00> : vector<24x128xf32>
    %18 = tpu.matmul %15, %17, %cst_9 {dimension_numbers = #tpu.dot_dimension_numbers<[1], [0], [0], [1], [0, 0, 1, 1], [], []>} : vector<24x24xbf16>, vector<24x128xbf16>, vector<24x128xf32> -> vector<24x128xf32>
    %19 = arith.addf %10, %18 : vector<24x128xf32>
    %c4_i32 = arith.constant 4 : i32
    %20 = arith.addi %0, %c4_i32 : i32
    %c0_10 = arith.constant 0 : index
    %21 = arith.index_cast %20 : i32 to index
    %c0_11 = arith.constant 0 : index
    %22 = vector.load %arg2[%c0_10, %21, %c0_11] : memref<1x28x24xf32, #tpu.memory_space<vmem>>, vector<1x24x24xf32>
    %23 = vector.shape_cast %22 : vector<1x24x24xf32> to vector<24x24xf32>
    %24 = arith.truncf %23 : vector<24x24xf32> to vector<24x24xbf16>
    %c2 = arith.constant 2 : index
    %c0_12 = arith.constant 0 : index
    %c0_13 = arith.constant 0 : index
    %25 = vector.load %arg3[%c2, %c0_12, %c0_13] : memref<3x24x128xbf16, #tpu.memory_space<vmem>>, vector<1x24x128xbf16>
    %26 = vector.shape_cast %25 : vector<1x24x128xbf16> to vector<24x128xbf16>
    %cst_14 = arith.constant dense<0.000000e+00> : vector<24x128xf32>
    %27 = tpu.matmul %24, %26, %cst_14 {dimension_numbers = #tpu.dot_dimension_numbers<[1], [0], [0], [1], [0, 0, 1, 1], [], []>} : vector<24x24xbf16>, vector<24x128xbf16>, vector<24x128xf32> -> vector<24x128xf32>
    %28 = arith.addf %19, %27 : vector<24x128xf32>
    %c0_15 = arith.constant 0 : index
    %c0_16 = arith.constant 0 : index
    %29 = vector.load %arg4[%c0_15, %c0_16] : memref<1x128xf32, #tpu.memory_space<vmem>>, vector<1x128xf32>
    %30 = vector.broadcast %29 : vector<1x128xf32> to vector<24x128xf32>
    %31 = arith.addf %28, %30 : vector<24x128xf32>
    %cst_17 = arith.constant 0.000000e+00 : f32
    %32 = vector.broadcast %cst_17 : f32 to vector<24x128xf32>
    %33 = arith.maximumf %31, %32 : vector<24x128xf32>
    %34 = arith.truncf %33 : vector<24x128xf32> to vector<24x128xbf16>
    %c0_18 = arith.constant 0 : index
    %c0_19 = arith.constant 0 : index
    %c0_20 = arith.constant 0 : index
    %35 = vector.load %arg5[%c0_18, %c0_19, %c0_20] : memref<1x24x128xbf16, #tpu.memory_space<vmem>>, vector<1x24x128xbf16>
    %36 = vector.shape_cast %35 : vector<1x24x128xbf16> to vector<24x128xbf16>
    %37 = vector.shape_cast %34 : vector<24x128xbf16> to vector<1x24x128xbf16>
    tpu.vector_store %arg5[%c0_18, %c0_19, %c0_20], %37 {strides = array<i32>} : memref<1x24x128xbf16, #tpu.memory_space<vmem>>, vector<1x24x128xbf16>,
    %38 = tpu.iota {dimensions = array<i32: 0>} : vector<24x1xi32>
    %39 = vector.broadcast %0 : i32 to vector<24x1xi32>
    %40 = arith.addi %39, %38 : vector<24x1xi32>
    %c17_i32 = arith.constant 17 : i32
    %41 = vector.broadcast %c17_i32 : i32 to vector<24x1xi32>
    %42 = arith.cmpi slt, %40, %41 : vector<24x1xi32>
    %cst_21 = arith.constant 0.000000e+00 : f32
    %43 = vector.shape_cast %42 : vector<24x1xi1> to vector<24x1xi1>
    %44 = vector.broadcast %43 : vector<24x1xi1> to vector<24x128xi1>
    %45 = vector.broadcast %cst_21 : f32 to vector<24x128xf32>
    %46 = arith.select %44, %33, %45 : vector<24x128xi1>, vector<24x128xf32>
    %cst_22 = arith.constant dense<0.000000e+00> : vector<128xf32>
    %47 = vector.multi_reduction <add>, %46, %cst_22 [0] : vector<24x128xf32> to vector<128xf32>
    %48 = vector.shape_cast %47 : vector<128xf32> to vector<1x128xf32>
    %c0_23 = arith.constant 0 : index
    %c0_24 = arith.constant 0 : index
    %c0_25 = arith.constant 0 : index
    %c0_26 = arith.constant 0 : index
    %49 = vector.load %arg6[%c0_23, %c0_24, %c0_25, %c0_26] : memref<1x1x1x128xf32, #tpu.memory_space<vmem>>, vector<1x1x1x128xf32>
    %50 = vector.shape_cast %49 : vector<1x1x1x128xf32> to vector<1x128xf32>
    %51 = vector.shape_cast %48 : vector<1x128xf32> to vector<1x1x1x128xf32>
    tpu.vector_store %arg6[%c0_23, %c0_24, %c0_25, %c0_26], %51 {strides = array<i32>} : memref<1x1x1x128xf32, #tpu.memory_space<vmem>>, vector<1x1x1x128xf32>,
    %52 = arith.mulf %46, %46 : vector<24x128xf32>
    %cst_27 = arith.constant dense<0.000000e+00> : vector<128xf32>
    %53 = vector.multi_reduction <add>, %52, %cst_27 [0] : vector<24x128xf32> to vector<128xf32>
    %54 = vector.shape_cast %53 : vector<128xf32> to vector<1x128xf32>
    %c0_28 = arith.constant 0 : index
    %c0_29 = arith.constant 0 : index
    %c0_30 = arith.constant 0 : index
    %c0_31 = arith.constant 0 : index
    %55 = vector.load %arg7[%c0_28, %c0_29, %c0_30, %c0_31] : memref<1x1x1x128xf32, #tpu.memory_space<vmem>>, vector<1x1x1x128xf32>
    %56 = vector.shape_cast %55 : vector<1x1x1x128xf32> to vector<1x128xf32>
    %57 = vector.shape_cast %54 : vector<1x128xf32> to vector<1x1x1x128xf32>
    tpu.vector_store %arg7[%c0_28, %c0_29, %c0_30, %c0_31], %57 {strides = array<i32>} : memref<1x1x1x128xf32, #tpu.memory_space<vmem>>, vector<1x1x1x128xf32>,
    return
  }
  func.func @transform_0(%arg0: i32, %arg1: i32) -> (i32, i32, i32) {
    %c0_i32 = arith.constant 0 : i32
    %c0_i32_0 = arith.constant 0 : i32
    %c0_i32_1 = arith.constant 0 : i32
    return %arg0, %c0_i32, %c0_i32_0 : i32, i32, i32
  }
  func.func @transform_1(%arg0: i32, %arg1: i32) -> (i32, i32, i32) {
    %c0_i32 = arith.constant 0 : i32
    %c0_i32_0 = arith.constant 0 : i32
    %c0_i32_1 = arith.constant 0 : i32
    %c0_i32_2 = arith.constant 0 : i32
    return %c0_i32, %c0_i32_0, %c0_i32_1 : i32, i32, i32
  }
  func.func @transform_2(%arg0: i32, %arg1: i32) -> (i32, i32) {
    %c0_i32 = arith.constant 0 : i32
    %c0_i32_0 = arith.constant 0 : i32
    %c0_i32_1 = arith.constant 0 : i32
    return %c0_i32, %c0_i32_0 : i32, i32
  }
  func.func @transform_3(%arg0: i32, %arg1: i32) -> (i32, i32, i32) {
    %c0_i32 = arith.constant 0 : i32
    %c0_i32_0 = arith.constant 0 : i32
    return %arg0, %arg1, %c0_i32 : i32, i32, i32
  }
  func.func @transform_4(%arg0: i32, %arg1: i32) -> (i32, i32, i32, i32) {
    %c0_i32 = arith.constant 0 : i32
    %c0_i32_0 = arith.constant 0 : i32
    %c0_i32_1 = arith.constant 0 : i32
    return %arg0, %arg1, %c0_i32, %c0_i32_0 : i32, i32, i32, i32
  }
  func.func @transform_5(%arg0: i32, %arg1: i32) -> (i32, i32, i32, i32) {
    %c0_i32 = arith.constant 0 : i32
    %c0_i32_0 = arith.constant 0 : i32
    %c0_i32_1 = arith.constant 0 : i32
    return %arg0, %arg1, %c0_i32, %c0_i32_0 : i32, i32, i32, i32
  }
}

</mosaic_0001>

<bundles_post_ra>
// kernel: tpu_custom_call.1
= control target key start
LH: loop header
LB: loop body
LE: loop exit
PB: predicated region body
PF: predicated region fallthrough
CT: control target
= control target key end

     0   :  { %11 = vsyncpa [#allocation3], 0  ;;  %s1310_s0 = inlined_call_operand.vmem [shape: f32[2,28,24], index: 0, kind: input, shape index: {}]   ;;  %s1311_s1 = inlined_call_operand.vmem [shape: bf16[3,24,128], index: 1, kind: input, shape index: {}]   ;;  %s1312_s2 = inlined_call_operand.vmem [shape: f32[1,128], index: 2, kind: input, shape index: {}]   ;;  %s1313_s3 = inlined_call_operand.hbm [shape: bf16[2,24,128], index: 3, kind: output, shape index: {0}]   ;;  %s1314_s4 = inlined_call_operand.hbm [shape: f32[2,1,1,128], index: 4, kind: output, shape index: {1}]   ;;  %s1315_s5 = inlined_call_operand.hbm [shape: f32[2,1,1,128], index: 5, kind: output, shape index: {2}]  }
   0x1   :  { %13 = vsyncpa [#allocation3 + $0x1], 0 }
   0x2   :  { %14 = vsyncpa [#allocation5], 0 }
   0x3   :  { %16 = vsyncpa [#allocation5 + $0x1], 0  ;;  %s1084_s18 = smov 0   ;;  %s1086_s19 = smov 0  }
   0x4   :  { %s1088_s20 = smov 0   ;;  %s1090_s21 = smov 0  }
   0x5   :  { %s1092_s22 = smov 0   ;;  %s1094_s23 = smov 0  }
   0x6 LB: > { %s752_s24 = sadd.s32 4294967295, %s1047_s23   ;;  %s1316_s25 = sadd.s32 4294967294, %s1047_s23   ;;  %s1047_s23 = sphi %s1094_s23, %s22_s23   ;;  %s1043_s22 = sphi %s1092_s22, %s1326_s22   ;;  %s1039_s21 = sphi %s1090_s21, %s1325_s21   ;;  %s1035_s20 = sphi %s1088_s20, %s1324_s20   ;;  %s1031_s19 = sphi %s1086_s19, %s1323_s19   ;;  %s1027_s18 = sphi %s1084_s18, %s1322_s18  }
   0x7   : > { %s34_s26 = sadd.s32 1, %s1043_s22  ;;  %s111_s27 = sadd.s32 1, %s1035_s20 }
   0x8   : > { %p36_p0 = scmp.ge.s32.totalorder %s34_s26, 2  ;;  %p121_p1 = scmp.ne.s32.totalorder %s1035_s20, %s1031_s19 }
   0x9   : > { %p122_p2 = scmp.eq.s32.totalorder %s752_s24, 1  ;;  %p127_p3 = scmp.ne.s32.totalorder %s1031_s19, %s1027_s18 }
   0xa   : > { %s1328_s26 = smov (%p36_p0, %s34_s26), 0  ;;  %p128_p5 = scmp.eq.s32.totalorder %s1316_s25, 1 }
   0xb   : > { %p1126_p4 = por %p122_p2, %p121_p1  ;;  %s106_s29 = ssub.s32 %s1043_s22, %s1328_s26 }
   0xc   : > { %p756_p6 = scmp.ge.s32.totalorder %s1047_s23, 1  ;;  %p109_p7 = scmp.eq.s32.totalorder %s106_s29, 0 }
   0xd   : > { %p1135_p8 = por %p128_p5, %p127_p3  ;;  %p216_p9 = scmp.lt.s32.totalorder %s1047_s23, 3 }
   0xe   : > { %s1141_s6 = scalar_select %p109_p7, %s1035_s20, %s111_s27  }
   0xf   : > { %p217_p10 = pnand %p756_p6, %p216_p9 }
  0x10   : > { %p252_p11 = scmp.lt.s32.totalorder (!%p217_p10), %s1039_s21, 1  ;;  %s1179_s11 = sand.u32 (!%p217_p10), 1, %s1031_s19  }
  0x11   : > { %220 = sbr.rel (%p217_p10) target bundleno = 308 (0x134), region = 32  ;;  %s1049_s10 = smov (!%p217_p10), [#allocation2]  }
  0x12   : > { %s840_s14 = smul.u32 (!%p217_p10), 12, %s1179_s11  ;;  %s919_s12 = sshll.u32 (!%p217_p10), %s1049_s10, 4  ;;  %s920_s12 = int_to_ptr.vmem [resolvable:$false] %s919_s12 }
  0x13   : > { %s921_s13 = scalar_lea.vmem (!%p217_p10), %s920_s12, 384 }
  0x14   : > { %s239_s15 = scalar_lea.vmem (!%p217_p10), [#allocation2], %s840_s14 }
  0x15   : > { %s588_s16 = sshll.u32 (!%p217_p10), %s239_s15, 4  ;;  %s1186_s16 = int_to_ptr.vmem [resolvable:$true] %s588_s16 }
  0x16   : > { %v909_v0 = vld [vmem:[%s1311_s1 + $0x14] ss:$0 sps:$4 sm:$0xff]   ;;  %vm296_vm0 = vcmask 1043456   ;;  %v911_v1 = vld [vmem:[%s1311_s1 + $0xc] sm:$0xff]   ;;  %v910_v2 = vld [vmem:[%s1311_s1 + $0x8] ss:$0 sps:$4 sm:$0xff]   ;;  %v523_v30 = vlaneseq  ;;  %p922_p1 = scmp.lt.s32.totalorder %s1186_s16, %s920_s12 }
  0x17   : > { %837 = vmatprep.subr.msk.bf16.mxu0 %vm296_vm0, %v909_v0  ;;  %v298_v3 = vsel %vm296_vm0, %v909_v0, 0  ;;  %v912_v4 = vld [vmem:[%s1311_s1] sm:$0xff]   ;;  %838 = vmatprep.subr.msk.bf16.mxu1 %vm296_vm0, %v910_v2  ;;  %v364_v5 = vsel %vm296_vm0, %v910_v2, 0  ;;  %s253_s17 = scalar_select %p252_p11, %s1039_s21, 1  ;;  %vm289_vm1 = vcmask 195584   ;;  %v914_v18 = vld [vmem:[%s1311_s1 + $0x18] sm:$0xff]  }
  0x18   : > { %814 = vmatpush3.bf16.msra.mxu0 %v298_v3  ;;  %822 = vmatpush3.bf16.msra.mxu1 %v364_v5  ;;  %v913_v6 = vld [vmem:[%s1311_s1 + $0x20] ss:$0 sps:$4 sm:$0xff]   ;;  %v524_v37 = vshrl.u32 %v523_v30, 7  ;;  %s915_s9 = scalar_lea.vmem %s1186_s16, 192 }
  0x19   : > { %815 = vmatprep.subr.bf16.mxu0 %v911_v1  ;;  %823 = vmatprep.subr.bf16.mxu1 %v912_v4  ;;  %s792_s27 = sshll.u32 %s253_s17, 5  ;;  %v441_v17 = vsel %vm296_vm0, %v913_v6, 0  ;;  %v783_v34 = vld [vmem:[%s1312_s2] ss:$0 sm:$0xff]  ;;  %s841_s17 = smul.u32 192, %s1039_s21 }
  0x1a   : > { %s256_s8 = scalar_lea.vmem %s1310_s0, %s792_s27  ;;  %v526_v45 = vadd.s32 16, %v524_v37  ;;  %p916_p12 = scmp.ne.s32.totalorder %s1186_s16, %s915_s9 }
  0x1b   : > { %v759_v7 = vld [vmem:[%s256_s8 + $0x2] sm:$0xff]  ;;  %v760_v8 = vld [vmem:[%s256_s8 + $0xa] sm:$0xff]  ;;  %v761_v12 = vld [vmem:[%s256_s8 + $0x12] sm:$0xff]  ;;  %s1191_s7 = scalar_lea.hbm %s1313_s3, %s841_s17  ;;  %p923_p2 = scmp.lt.s32.totalorder %s921_s13, %s915_s9 }
  0x1c   : > { %816 = vmatpush3.bf16.msra.mxu0 %v911_v1  ;;  %824 = vmatpush3.bf16.msra.mxu1 %v912_v4  ;;  %v261_v9 = vld [vmem:[%s256_s8] sm:$0xff]  ;;  %v274_v10 = vpack.c.bf16 %v760_v8, %v759_v7  ;;  %v262_v11 = vld [vmem:[%s256_s8 + $0x8] sm:$0xff]  ;;  %v263_v13 = vld [vmem:[%s256_s8 + $0x10] sm:$0xff]  ;;  %v275_v15 = vpack.c.bf16 %v761_v12, %v761_v12  ;;  %vm533_vm2 = vcmp.lt.s32.totalorder %v526_v45, 17  ;;  %p917_p13 = pnand %p916_p12, %p1126_p4 }
  0x1d   : > { %839 = vmatprep.subr.msk.bf16.mxu0 %vm296_vm0, %v913_v6  ;;  %v264_v14 = vpack.c.bf16 %v262_v11, %v261_v9  ;;  %v265_v16 = vpack.c.bf16 %v263_v13, %v263_v13  ;;  %v773_v19 = vld [vmem:[%s256_s8 + $0x4] sm:$0xff]  ;;  %v774_v20 = vld [vmem:[%s256_s8 + $0xc] sm:$0xff]  ;;  %v775_v22 = vld [vmem:[%s256_s8 + $0x14] sm:$0xff]  ;;  %s565_s8 = scalar_lea.sflag [#allocation3], %s1179_s11  ;;  %p924_p3 = por %p923_p2, %p922_p1 }
  0x1e   : > { %817 = vmatprep.mubr.msk.bf16.mxu0 %vm289_vm1, %v274_v10  ;;  %v419_v21 = vpack.c.bf16 %v774_v20, %v773_v19  ;;  %v420_v23 = vpack.c.bf16 %v775_v22, %v775_v22  ;;  %p918_p0 = pneg %p917_p13 }
  0x1f   : > { %825 = vmatprep.mubr.msk.bf16.mxu1 %vm289_vm1, %v264_v14  ;;  %818 = vmatmul.mubr.msk.bf16.vlgmr.msra.gmra.mxu0 %vm289_vm1, %v275_v15 }
  0x20   : > { %826 = vmatmul.mubr.msk.bf16.vlgmr.msra.gmra.mxu1 %vm289_vm1, %v265_v16  ;;  %830 = vmatpush3.bf16.msra.mxu0 %v441_v17  ;;  %p925_p5 = pnand %p924_p3, %p918_p0 }
  0x21   : > { %831 = vmatprep.subr.bf16.mxu0 %v914_v18  ;;  %833 = vmatprep.mubr.msk.bf16.mxu0 %vm289_vm1, %v419_v21 }
  0x24   : > { %832 = vmatpush3.bf16.msra.mxu0 %v914_v18 }
  0x27   : > { %834 = vmatmul.mubr.msk.bf16.vlgmr.msra.gmra.mxu0 %vm289_vm1, %v420_v23 }
  0xdf   : > { %v819_v24 = vpop.f32.mrf.mxu0 }
  0xe0   : > { %v827_v25 = vpop.f32.mrf.mxu1 }
  0xe1   : > { %v334_v26 = vpop.f32.mrf.mxu0  ;;  %v409_v32 = vadd.f32 %v827_v25, %v819_v24 }
  0xe2   : > { %v400_v27 = vpop.f32.mrf.mxu1 }
  0xe3   : > { %v820_v28 = vpop.f32.mrf.mxu0  ;;  %v401_v35 = vadd.f32 %v400_v27, %v334_v26 }
  0xe4   : > { %v828_v29 = vpop.f32.mrf.mxu1 }
  0xe5   : > { %v337_v31 = vpop.f32.mrf.mxu0 }
  0xe6   : > { %v403_v38 = vpop.f32.mrf.mxu1 }
  0xe7   : > { %v835_v33 = vpop.f32.mrf.mxu0  ;;  %v404_v43 = vadd.f32 %v403_v38, %v337_v31 }
  0xe8   : > { %v493_v36 = vadd.f32 %v835_v33, %v409_v32 }
  0xe9   : > { %v477_v39 = vpop.f32.mrf.mxu0 }
  0xea   : > { %v503_v40 = vadd.f32 %v783_v34, %v493_v36  ;;  %v491_v41 = vadd.f32 %v477_v39, %v401_v35 }
  0xeb   : > { %v836_v42 = vpop.f32.mrf.mxu0 }
  0xec   : > { %v506_v44 = vmax.f32 %v503_v40, 0.0  ;;  %v501_v46 = vadd.f32 %v783_v34, %v491_v41 }
  0xed   : > { %v480_v47 = vpop.f32.mrf.mxu0 }
  0xee   : > { %v795_v48 = vpack.c.bf16 %v506_v44, %v506_v44  ;;  %v492_v49 = vadd.f32 %v480_v47, %v404_v43  ;;  %v504_v50 = vmax.f32 %v501_v46, 0.0  ;;  %v542_v53 = vsel %vm533_vm2, %v506_v44, 0.0 }
  0xef   : > { %v554_v58 = vmul.f32 %v542_v53, %v542_v53 }
  0xf0   : > { %522 = vst [vmem:[%s239_s15 + $0x8] sm:$0xf] %v795_v48  ;;  %v502_v51 = vadd.f32 %v783_v34, %v492_v49  ;;  %v552_v54 = vmul.f32 %v504_v50, %v504_v50 }
  0xf2   : > { %v505_v52 = vmax.f32 %v502_v51, 0.0 }
  0xf4   : > { %v799_v55 = vpack.c.bf16 %v505_v52, %v504_v50  ;;  %v543_v56 = vadd.f32 %v505_v52, %v504_v50  ;;  %v553_v57 = vmul.f32 %v505_v52, %v505_v52 }
  0xf6   : > { %800 = vst [vmem:[%s239_s15] sm:$0xff] %v799_v55   ;;  %v544_v59 = vadd.f32 %v543_v56, %v542_v53  ;;  %v555_v60 = vadd.f32 %v553_v57, %v552_v54 }
  0xf7   : > { %928 = shalt.err (!%p925_p5)
}
  0xf8   : > { %s929_s14 = scalar_lea.hbm %s1191_s7, 192  ;;  %s933_s27 = scalar_lea.hbm %s1313_s3, 384 }
  0xf9   : > { %p930_p6 = scmp.ne.s32.totalorder %s1191_s7, %s929_s14  ;;  %p934_p10 = scmp.lt.s32.totalorder %s1191_s7, %s1313_s3 }
  0xfa   : > { %p935_p11 = scmp.lt.s32.totalorder %s933_s27, %s929_s14 }
  0xfb   : > { %p931_p7 = pnand %p930_p6, %p1126_p4 }
  0xfc   : > { %p936_p12 = por %p935_p11, %p934_p10 }
  0xfd   : > { %p932_p9 = pneg %p931_p7 }
  0xff   : > { %p937_p13 = pnand %p936_p12, %p932_p9 }
 0x101   : > { %940 = shalt.err (!%p937_p13)
}
 0x102   : > { %s1050_s9 = smov 64   ;;  %s1051_s12 = smov 4   ;;  %v556_v61 = vadd.f32 %v555_v60, %v554_v58  ;;  %v545_v62 = vrot.slane %v544_v59, 4 }
 0x103   : > { %842 = dma.vmem_to_hbm [thread:$0]  (%p1126_p4), %s1186_s16, 192, %s1191_s7, %s565_s8, %s1050_s9, %s1050_s9, %s1051_s12  }
 0x104   : > { %v557_v63 = vrot.slane %v556_v61, 4  ;;  %v546_v0 = vadd.f32 %v545_v62, %v544_v59  ;;  %s1218_s13 = sand.u32 1, %s752_s24   ;;  %s788_s14 = sshll.u32 %s1039_s21, 4 }
 0x105   : > { %s245_s15 = scalar_lea.vmem [#allocation4], %s1179_s11  ;;  %s1317_s16 = scalar_lea.vmem [#allocation6], %s1179_s11 }
 0x106   : > { %v547_v1 = vrot.slane %v546_v0, 2  ;;  %v558_v2 = vadd.f32 %v557_v63, %v556_v61  ;;  %s605_s17 = sshll.u32 %s245_s15, 4  ;;  %s619_s7 = sshll.u32 %s1317_s16, 4  ;;  %s1230_s17 = int_to_ptr.vmem [resolvable:$true] %s605_s17  ;;  %s1237_s7 = int_to_ptr.vmem [resolvable:$true] %s619_s7 }
 0x107   : > { %s1228_s29 = scalar_lea.hbm %s1314_s4, %s788_s14  ;;  %s1235_s10 = scalar_lea.hbm %s1315_s5, %s788_s14 }
 0x108   : > { %v548_v3 = vadd.f32 %v547_v1, %v546_v0  ;;  %v559_v4 = vrot.slane %v558_v2, 2  ;;  %s570_s9 = scalar_lea.sflag [#allocation5], %s1218_s13  ;;  %s941_s12 = scalar_lea.vmem %s1230_s17, 16 }
 0x109   : > { %p942_p0 = scmp.ne.s32.totalorder %s1230_s17, %s941_s12  ;;  %s1052_s8 = smov [#allocation4]  }
 0x10a   : > { %v549_v5 = vrot.slane %v548_v3, 1  ;;  %v560_v6 = vadd.f32 %v559_v4, %v558_v2  ;;  %s945_s27 = sshll.u32 %s1052_s8, 4  ;;  %s946_s27 = int_to_ptr.vmem [resolvable:$false] %s945_s27 }
 0x10b   : > { %p943_p1 = pnand %p942_p0, %p1126_p4  ;;  %s947_s25 = scalar_lea.vmem %s946_s27, 32 }
 0x10c   : > { %v550_v7 = vadd.f32 %v549_v5, %v548_v3  ;;  %v561_v8 = vrot.slane %v560_v6, 1  ;;  %p948_p3 = scmp.lt.s32.totalorder %s1230_s17, %s946_s27  ;;  %p949_p5 = scmp.lt.s32.totalorder %s947_s25, %s941_s12 }
 0x10d   : > { %p944_p2 = pneg %p943_p1 }
 0x10e   : > { %551 = vst [vmem:[%s245_s15] sm:$0x1] %v550_v7  ;;  %v562_v9 = vadd.f32 %v561_v8, %v560_v6  ;;  %p950_p6 = por %p949_p5, %p948_p3 }
 0x110   : > { %p951_p7 = pnand %p950_p6, %p944_p2 }
 0x112   : > { %954 = shalt.err (!%p951_p7)
}
 0x113   : > { %s955_s14 = scalar_lea.hbm %s1228_s29, 16  ;;  %s959_s24 = scalar_lea.hbm %s1314_s4, 32 }
 0x114   : > { %p956_p9 = scmp.ne.s32.totalorder %s1228_s29, %s955_s14  ;;  %p960_p12 = scmp.lt.s32.totalorder %s1228_s29, %s1314_s4 }
 0x115   : > { %p961_p13 = scmp.lt.s32.totalorder %s959_s24, %s955_s14 }
 0x116   : > { %p957_p10 = pnand %p956_p9, %p1126_p4 }
 0x117   : > { %p962_p0 = por %p961_p13, %p960_p12 }
 0x118   : > { %p958_p11 = pneg %p957_p10 }
 0x11a   : > { %p963_p1 = pnand %p962_p0, %p958_p11 }
 0x11c   : > { %966 = shalt.err (!%p963_p1)
}
 0x11d   : > { %843 = dma.vmem_to_hbm [thread:$0]  (%p1126_p4), %s1230_s17, 16, %s1228_s29, %s570_s9  }
 0x11e   : > { %s1320_s25 = scalar_lea.vmem [#allocation6], %s1179_s11  ;;  %s967_s16 = scalar_lea.vmem %s1237_s7, 16 }
 0x11f   : > { %563 = vst [vmem:[%s1320_s25] sm:$0x1] %v562_v9  ;;  %p968_p2 = scmp.ne.s32.totalorder %s1237_s7, %s967_s16  ;;  %s1053_s12 = smov [#allocation6]  }
 0x120   : > { %s971_s27 = sshll.u32 %s1053_s12, 4  ;;  %s972_s27 = int_to_ptr.vmem [resolvable:$false] %s971_s27 }
 0x121   : > { %p969_p3 = pnand %p968_p2, %p1126_p4  ;;  %s973_s14 = scalar_lea.vmem %s972_s27, 32 }
 0x122   : > { %p974_p6 = scmp.lt.s32.totalorder %s1237_s7, %s972_s27  ;;  %p975_p7 = scmp.lt.s32.totalorder %s973_s14, %s967_s16 }
 0x123   : > { %p970_p5 = pneg %p969_p3 }
 0x124   : > { %p976_p9 = por %p975_p7, %p974_p6 }
 0x126   : > { %p977_p10 = pnand %p976_p9, %p970_p5 }
 0x128   : > { %980 = shalt.err (!%p977_p10)
}
 0x129   : > { %s981_s11 = scalar_lea.hbm %s1235_s10, 16  ;;  %s985_s15 = scalar_lea.hbm %s1315_s5, 32 }
 0x12a   : > { %p982_p11 = scmp.ne.s32.totalorder %s1235_s10, %s981_s11  ;;  %p986_p0 = scmp.lt.s32.totalorder %s1235_s10, %s1315_s5 }
 0x12b   : > { %p987_p1 = scmp.lt.s32.totalorder %s985_s15, %s981_s11 }
 0x12c   : > { %p983_p12 = pnand %p982_p11, %p1126_p4 }
 0x12d   : > { %p988_p2 = por %p987_p1, %p986_p0 }
 0x12e   : > { %p984_p13 = pneg %p983_p12 }
 0x130   : > { %p989_p3 = pnand %p988_p2, %p984_p13 }
 0x132   : > { %992 = shalt.err (!%p989_p3)
}
 0x133   : > { %844 = dma.vmem_to_hbm [thread:$0]  (%p1126_p4), %s1237_s7, 16, %s1235_s10, %s570_s9  }
 0x134 PF: > { %p858_p5 = scmp.ge.s32.totalorder %s1047_s23, 2  ;;  %s631_s8 = sand.u32 1, %s1027_s18  }
 0x135   : > { %s632_s25 = scalar_lea.sflag [#allocation3], %s631_s8 }
 0x136   : > { %p849_p6 = pnand %p858_p5, %p1135_p8 }
 0x138   : > { %p850_p7 = pneg %p849_p6 }
 0x13a   : > { %1018 = dma.done.wait (%p850_p7), %s632_s25, 192  }
 0x13b   : > { %1020 = vsyncadd (%p850_p7), %s632_s25, 4294967104  ;;  %s1321_s16 = sadd.s32 4294967294, %s1047_s23  }
 0x13c   : > { %s640_s28 = sand.u32 1, %s1321_s16  }
 0x13d   : > { %s641_s12 = scalar_lea.sflag [#allocation5], %s640_s28 }
 0x13e   : > { %1022 = dma.done.wait (%p850_p7), %s641_s12, 32  }
 0x13f   : > { %1024 = vsyncadd (%p850_p7), %s641_s12, 4294967264  ;;  %s22_s23 = sadd.s32 1, %s1047_s23   ;;  %s1322_s18 = smov %s1031_s19 }
 0x140   : > { %p19_p4 = scmp.ge.s32.totalorder %s22_s23, 4   ;;  %s1323_s19 = smov %s1035_s20 }
 0x141   : > { %s1324_s20 = smov %s1141_s6  ;;  %s1325_s21 = smov %s1043_s22 }
 0x142   : > { %s1326_s22 = smov %s1328_s26  ;;  %21 = sbr.rel (!%p19_p4) target bundleno = 6 (0x6), region = 104 }
 0x147   :  { %653 = vsyncpa [#allocation3], 1 }
 0x148   :  { %655 = vsyncpa [#allocation3 + $0x1], 1 }
 0x149   :  { %656 = vsyncpa [#allocation5], 1 }
 0x14a   :  { %658 = vsyncpa [#allocation5 + $0x1], 1 }

</bundles_post_ra>
